<compile_context>
chip_gen: v6e
topology: v6e:2x2x1
jax: 0.10.0
libtpu: 0.0.40
codegen_flags: <defaults>
</compile_context>

<pallas_src>
import functools
import math

import jax
import jax.numpy as jnp
from jax.experimental import pallas as pl
from jax.experimental.pallas import tpu as pltpu

D_MODEL = 32
MAX_LEN = 5000
DROPOUT_P = 0.1

_LANES = 128
_DEFAULT_TILE_ROWS = 2048                       # 2048 * 128 * 4 B = 1 MiB per f32 tile
_DROP_THRESHOLD = int(round(DROPOUT_P * (1 << 32)))  # P(bits < thr) == DROPOUT_P


def _round_up(v: int, m: int) -> int:
    return ((v + m - 1) // m) * m


def _build_pe(d_model: int, max_len: int) -> jnp.ndarray:
    """Same buffer the torch module builds in __init__: [max_len, 1, d_model]."""
    position = jnp.arange(max_len, dtype=jnp.float32)[:, None]
    div_term = jnp.exp(
        jnp.arange(0, d_model, 2, dtype=jnp.float32) * (-math.log(10000.0) / d_model)
    )
    pe = jnp.zeros((max_len, 1, d_model), dtype=jnp.float32)
    pe = pe.at[:, 0, 0::2].set(jnp.sin(position * div_term))
    pe = pe.at[:, 0, 1::2].set(jnp.cos(position * div_term))
    return pe


def _geometry(n_elems: int, tile_rows: int):
    """Padded row count and tile size for the lane-dense [rows, 128] view."""
    n_rows = _round_up(n_elems, _LANES) // _LANES
    tile_rows = min(tile_rows, _round_up(n_rows, 8))   # (8, 128) tiling constraint
    n_rows_pad = _round_up(n_rows, tile_rows)
    return n_rows_pad, tile_rows


def _dropout_bits(key, n_rows_pad: int) -> jnp.ndarray:
    return jax.random.bits(key, (n_rows_pad, _LANES), dtype=jnp.uint32)


def _posenc_dropout_kernel(x_ref, pe_ref, bits_ref, o_ref, *, keep_scale):
    # All refs are lane-dense [tile_rows, 128] tiles.
    y = x_ref[...] + pe_ref[...]                                       # PE add
    keep = (bits_ref[...] >= jnp.uint32(_DROP_THRESHOLD)).astype(y.dtype)
    o_ref[...] = (y * (keep * jnp.asarray(keep_scale, y.dtype))).astype(o_ref.dtype)


def positional_encoding_forward(x, pe_full, key, *, dropout_p=DROPOUT_P,
                                tile_rows=_DEFAULT_TILE_ROWS):
    """x: [seq_len, batch, d_model] -> same shape (training-mode dropout)."""
    s, b, d = x.shape
    n = s * b * d
    n_rows_pad, tile_rows = _geometry(n, tile_rows)
    n_pad = n_rows_pad * _LANES

    # Broadcast pe over batch in the wrapper so the kernel stays lane-dense.
    pe = jnp.broadcast_to(pe_full[:s].astype(x.dtype), (s, b, d))

    def to_2d(a):
        flat = a.reshape(-1)
        flat = jnp.pad(flat, (0, n_pad - n))
        return flat.reshape(n_rows_pad, _LANES)

    x2 = to_2d(x)
    pe2 = to_2d(pe)
    bits2 = _dropout_bits(key, n_rows_pad)

    spec = pl.BlockSpec((tile_rows, _LANES), lambda i: (i, 0))
    grid = (n_rows_pad // tile_rows,)

    out2 = pl.pallas_call(
        functools.partial(_posenc_dropout_kernel,
                          keep_scale=1.0 / (1.0 - dropout_p)),
        out_shape=jax.ShapeDtypeStruct((n_rows_pad, _LANES), x.dtype),
        grid=grid,
        in_specs=[spec, spec, spec],
        out_specs=spec,
        compiler_params=pltpu.CompilerParams(
            dimension_semantics=("parallel",)),
    )(x2, pe2, bits2)

    return out2.reshape(-1)[:n].reshape(s, b, d)


if __name__ == "__main__":
    key = jax.random.PRNGKey(0)
    x_key, drop_key = jax.random.split(key)

    seq_len, batch, d_model = 8, 2, D_MODEL
    x = jax.random.normal(x_key, (seq_len, batch, d_model), dtype=jnp.float32)
    pe_full = _build_pe(d_model, MAX_LEN)

    out = positional_encoding_forward(x, pe_full, drop_key)
    out = jax.block_until_ready(out)
    assert out.shape == (seq_len, batch, d_model)

    # Exact reference: rebuild the same keep mask from the same key/geometry.
    n = seq_len * batch * d_model
    n_rows_pad, _ = _geometry(n, _DEFAULT_TILE_ROWS)
    bits = _dropout_bits(drop_key, n_rows_pad)
    keep = (bits.reshape(-1)[:n] >= jnp.uint32(_DROP_THRESHOLD)).reshape(
        seq_len, batch, d_model)
    expected = jnp.where(
        keep, (x + pe_full[:seq_len]) / (1.0 - DROPOUT_P), 0.0
    ).astype(x.dtype)
    assert bool(jnp.allclose(out, expected, atol=1e-5, rtol=1e-5))

    print("KERNEL_OK")
</pallas_src>

<mosaic_0001>
module attributes {stable_mosaic.version = 11 : i64} {
  func.func @_posenc_dropout_kernel(%arg0: i32, %arg1: memref<8x128xf32, #tpu.memory_space<vmem>>, %arg2: memref<8x128xf32, #tpu.memory_space<vmem>>, %arg3: memref<8x128xi32, #tpu.memory_space<vmem>>, %arg4: memref<8x128xf32, #tpu.memory_space<vmem>>) attributes {dimension_semantics = [#tpu.dimension_semantics<parallel>], iteration_bounds = array<i64: 1>, scalar_prefetch = 0 : i64, scratch_operands = 0 : i64, tpu.core_type = #tpu.core_type<tc>, window_params = [{transform_indices = @transform_0, window_bounds = array<i64: 8, 128>}, {transform_indices = @transform_1, window_bounds = array<i64: 8, 128>}, {transform_indices = @transform_2, window_bounds = array<i64: 8, 128>}, {transform_indices = @transform_3, window_bounds = array<i64: 8, 128>}]} {
    %c0 = arith.constant 0 : index
    %c0_0 = arith.constant 0 : index
    %0 = vector.load %arg1[%c0, %c0_0] : memref<8x128xf32, #tpu.memory_space<vmem>>, vector<8x128xf32>
    %c0_1 = arith.constant 0 : index
    %c0_2 = arith.constant 0 : index
    %1 = vector.load %arg2[%c0_1, %c0_2] : memref<8x128xf32, #tpu.memory_space<vmem>>, vector<8x128xf32>
    %2 = arith.addf %0, %1 : vector<8x128xf32>
    %c0_3 = arith.constant 0 : index
    %c0_4 = arith.constant 0 : index
    %3 = vector.load %arg3[%c0_3, %c0_4] : memref<8x128xi32, #tpu.memory_space<vmem>>, vector<8x128xi32>
    %c429496730_i32 = arith.constant 429496730 : i32
    %4 = vector.broadcast %c429496730_i32 : i32 to vector<8x128xi32>
    %5 = arith.cmpi uge, %3, %4 : vector<8x128xi32>
    %6 = arith.extui %5 : vector<8x128xi1> to vector<8x128xi32>
    %7 = arith.sitofp %6 : vector<8x128xi32> to vector<8x128xf32>
    %cst = arith.constant 1.11111116 : f32
    %8 = vector.broadcast %cst : f32 to vector<8x128xf32>
    %9 = arith.mulf %7, %8 : vector<8x128xf32>
    %10 = arith.mulf %2, %9 : vector<8x128xf32>
    %c0_5 = arith.constant 0 : index
    %c0_6 = arith.constant 0 : index
    %11 = vector.load %arg4[%c0_5, %c0_6] : memref<8x128xf32, #tpu.memory_space<vmem>>, vector<8x128xf32>
    tpu.vector_store %arg4[%c0_5, %c0_6], %10 {strides = array<i32>} : memref<8x128xf32, #tpu.memory_space<vmem>>, vector<8x128xf32>,
    return
  }
  func.func @transform_0(%arg0: i32) -> (i32, i32) {
    %c0_i32 = arith.constant 0 : i32
    %c0_i32_0 = arith.constant 0 : i32
    return %arg0, %c0_i32 : i32, i32
  }
  func.func @transform_1(%arg0: i32) -> (i32, i32) {
    %c0_i32 = arith.constant 0 : i32
    %c0_i32_0 = arith.constant 0 : i32
    return %arg0, %c0_i32 : i32, i32
  }
  func.func @transform_2(%arg0: i32) -> (i32, i32) {
    %c0_i32 = arith.constant 0 : i32
    %c0_i32_0 = arith.constant 0 : i32
    return %arg0, %c0_i32 : i32, i32
  }
  func.func @transform_3(%arg0: i32) -> (i32, i32) {
    %c0_i32 = arith.constant 0 : i32
    %c0_i32_0 = arith.constant 0 : i32
    return %arg0, %c0_i32 : i32, i32
  }
}

</mosaic_0001>

<bundles_post_ra>
// kernel: tpu_custom_call.1
= control target key start
LH: loop header
LB: loop body
LE: loop exit
PB: predicated region body
PF: predicated region fallthrough
CT: control target
= control target key end

     0   :  { %8 = vsyncpa [#allocation3], 0  ;;  %s205_s0 = inlined_call_operand.hbm [shape: f32[8,128], index: 0, kind: input, shape index: {}]   ;;  %s206_s1 = inlined_call_operand.hbm [shape: f32[8,128], index: 1, kind: input, shape index: {}]   ;;  %s207_s2 = inlined_call_operand.hbm [shape: u32[8,128], index: 2, kind: input, shape index: {}]   ;;  %s208_s3 = inlined_call_operand.hbm [shape: f32[8,128], index: 3, kind: output, shape index: {}]  }
   0x1   :  { %9 = vsyncpa [#allocation6], 0 }
   0x2   :  { %10 = vsyncpa [#allocation4], 0  ;;  %s168_s12 = smov [#allocation5]   ;;  %s169_s14 = smov [#allocation2]  }
   0x3   :  { %s27_s13 = sshll.u32 %s168_s12, 4  ;;  %s17_s15 = sshll.u32 %s169_s14, 4  ;;  %s28_s13 = int_to_ptr.vmem [resolvable:$true] %s27_s13  ;;  %s18_s15 = int_to_ptr.vmem [resolvable:$true] %s17_s15 }
   0x4   :  { %s90_s16 = scalar_lea.vmem %s28_s13, 128  ;;  %p95_p1 = scmp.lt.s32.totalorder %s28_s13, %s28_s13 }
   0x5   :  { %p91_p0 = scmp.ne.s32.totalorder %s28_s13, %s90_s16  ;;  %p96_p2 = scmp.lt.s32.totalorder %s90_s16, %s90_s16 }
   0x7   :  { %p97_p3 = por %p96_p2, %p95_p1 }
   0x9   :  { %p98_p4 = pnand %p97_p3, %p91_p0 }
   0xb   :  { %101 = shalt.err (!%p98_p4)
}
   0xc   :  { %30 = dma.hbm_to_vmem [thread:$0]  %s206_s1, 128, %s28_s13, [#allocation6]  }
   0xd   :  { %s110_s19 = scalar_lea.vmem %s18_s15, 128  ;;  %p115_p6 = scmp.lt.s32.totalorder %s18_s15, %s18_s15 }
   0xe   :  { %p111_p5 = scmp.ne.s32.totalorder %s18_s15, %s110_s19  ;;  %p116_p7 = scmp.lt.s32.totalorder %s110_s19, %s110_s19 }
  0x10   :  { %p117_p8 = por %p116_p7, %p115_p6 }
  0x12   :  { %p118_p9 = pnand %p117_p8, %p111_p5 }
  0x14   :  { %121 = shalt.err (!%p118_p9)
}
  0x15   :  { %20 = dma.hbm_to_vmem [thread:$0]  %s205_s0, 128, %s18_s15, [#allocation3]  }
  0x16   :  { %s170_s22 = smov [#allocation7]  }
  0x17   :  { %s37_s23 = sshll.u32 %s170_s22, 4  ;;  %s38_s23 = int_to_ptr.vmem [resolvable:$true] %s37_s23 }
  0x18   :  { %s130_s24 = scalar_lea.vmem %s38_s23, 128  ;;  %p135_p11 = scmp.lt.s32.totalorder %s38_s23, %s38_s23 }
  0x19   :  { %p131_p10 = scmp.ne.s32.totalorder %s38_s23, %s130_s24  ;;  %p136_p12 = scmp.lt.s32.totalorder %s130_s24, %s130_s24 }
  0x1b   :  { %p137_p13 = por %p136_p12, %p135_p11 }
  0x1d   :  { %p138_p0 = pnand %p137_p13, %p131_p10 }
  0x1f   :  { %141 = shalt.err (!%p138_p0)
}
  0x20   :  { %40 = dma.hbm_to_vmem [thread:$0]  %s207_s2, 128, %s38_s23, [#allocation6]  }
  0x21   :  { %162 = dma.done.wait [#allocation3], 128  }
  0x22   :  { %163 = vsyncadd [#allocation3], 4294967168 }
  0x23   :  { %164 = dma.done.wait [#allocation6], 256  }
  0x24   :  { %165 = vsyncadd [#allocation6], 4294967040  ;;  %v50_v0 = vld [vmem:[#allocation2] sm:$0xff]  ;;  %v51_v1 = vld [vmem:[#allocation5] sm:$0xff]  ;;  %v171_v4 = vmov 0.0   ;;  %s172_s0 = smov [#allocation8]  }
  0x25   :  { %v53_v2 = vld [vmem:[#allocation7] sm:$0xff]  ;;  %v52_v3 = vadd.f32 %v51_v1, %v50_v0  ;;  %s66_s26 = sshll.u32 %s172_s0, 4  ;;  %s67_s26 = int_to_ptr.vmem [resolvable:$true] %s66_s26 }
  0x26   :  { %vm54_vm0 = vcmp.ge.u32.totalorder %v53_v2, 429496730  ;;  %s142_s27 = scalar_lea.vmem %s67_s26, 128  ;;  %p147_p2 = scmp.lt.s32.totalorder %s67_s26, %s67_s26 }
  0x27   :  { %v76_v5 = vsel %vm54_vm0, 1.0, %v171_v4  ;;  %p143_p1 = scmp.ne.s32.totalorder %s67_s26, %s142_s27  ;;  %p148_p3 = scmp.lt.s32.totalorder %s142_s27, %s142_s27 }
  0x28   :  { %v57_v6 = vmul.f32 1.1111112, %v76_v5 }
  0x29   :  { %p149_p4 = por %p148_p3, %p147_p2 }
  0x2a   :  { %v58_v7 = vmul.f32 %v57_v6, %v52_v3 }
  0x2b   :  { %p150_p5 = pnand %p149_p4, %p143_p1 }
  0x2c   :  { %59 = vst [vmem:[#allocation8] sm:$0xff] %v58_v7 }
  0x2d   :  { %153 = shalt.err (!%p150_p5)
}
  0x2e   :  { %69 = dma.vmem_to_hbm [thread:$0]  %s67_s26, 128, %s208_s3, [#allocation4]  }
  0x2f   :  { %166 = dma.done.wait [#allocation4], 128  }
  0x30   :  { %167 = vsyncadd [#allocation4], 4294967168 }
  0x31   :  { %73 = vsyncpa [#allocation3], 1 }
  0x32   :  { %74 = vsyncpa [#allocation6], 1 }
  0x33   :  { %75 = vsyncpa [#allocation4], 1 }

</bundles_post_ra>
